<compile_context>
chip_gen: v7x
topology: tpu7x:2x2x1
jax: 0.10.0
libtpu: 0.0.40
codegen_flags: <defaults>
</compile_context>

<pallas_src>
import functools

import jax
import jax.numpy as jnp
from jax import lax
from jax.experimental import pallas as pl
from jax.experimental.pallas import tpu as pltpu


# --------------------------------------------------------------------------- #
# Kernel 1: fused k/v projection (row-tiled)
# --------------------------------------------------------------------------- #
def kv_proj_kernel(x_ref, wkv_ref, bkv_ref, k_ref, v_ref):
    C = k_ref.shape[-1]
    y = jnp.dot(x_ref[0], wkv_ref[...], preferred_element_type=jnp.float32)
    y = y + bkv_ref[...]                                        # (TQ, 2C) f32
    k_ref[0] = y[:, :C].astype(k_ref.dtype)
    v_ref[0] = y[:, C:].astype(v_ref.dtype)


# --------------------------------------------------------------------------- #
# Kernel 2: q-proj + multi-head attention + local-pos DWConv + output proj
# --------------------------------------------------------------------------- #
def attn_kernel(x_ref, wq_ref, bq_ref, k_ref, v_ref, dww_ref, dwb_ref,
                wp_ref, bp_ref, o_ref, lp_ref, att_ref, *, head, W):
    N, C = k_ref.shape[1], k_ref.shape[2]
    TQ = x_ref.shape[1]
    d = C // head
    i = pl.program_id(1)

    # ---- once per batch: depthwise 3x3 local-pos conv over the resident v ----
    # (v's block index only changes with the batch axis, so the full (N, C) v
    #  stays resident across i; inner grid axis is "arbitrary" => i==0 first.)
    @pl.when(i == 0)
    def _():
        v_full = v_ref[0].astype(jnp.float32)                   # (N, C)
        taps = dww_ref[...].astype(jnp.float32)                 # (9, C)
        pad = W + 1
        zpad = jnp.zeros((pad, C), jnp.float32)
        vp = jnp.concatenate([zpad, v_full, zpad], axis=0)      # (N + 2W + 2, C)
        col = lax.broadcasted_iota(jnp.int32, (N, 1), 0) % W
        ok_left = col >= 1          # neighbour column j-1 valid
        ok_right = col <= W - 2     # neighbour column j+1 valid
        acc = v_full * taps[4] + dwb_ref[...].astype(jnp.float32)
        for di in (-1, 0, 1):
            for dj in (-1, 0, 1):
                if di == 0 and dj == 0:
                    continue
                s = di * W + dj                                  # flat-seq shift
                term = vp[pad + s:pad + s + N, :] * taps[(di + 1) * 3 + (dj + 1)]
                if dj == -1:
                    term = jnp.where(ok_left, term, 0.0)
                elif dj == 1:
                    term = jnp.where(ok_right, term, 0.0)
                acc = acc + term
        lp_ref[...] = acc

    # ---- q projection for this tile (scale pre-folded into wq/bq) -----------
    q = (jnp.dot(x_ref[0], wq_ref[...], preferred_element_type=jnp.float32)
         + bq_ref[...]).astype(k_ref.dtype)                     # (TQ, C)
    k = k_ref[0]                                                # (N,  C)
    v = v_ref[0]                                                # (N,  C)

    # ---- per-head attention, deferred softmax normalisation -----------------
    for h in range(head):
        lo = h * d
        s = lax.dot_general(q[:, lo:lo + d], k[:, lo:lo + d],
                            (((1,), (1,)), ((), ())),
                            preferred_element_type=jnp.float32)  # (TQ, N)
        m = jnp.max(s, axis=-1, keepdims=True)
        p = jnp.exp(s - m)                                       # unnormalised
        denom = jnp.sum(p, axis=-1, keepdims=True)               # (TQ, 1)
        oh = jnp.dot(p.astype(v.dtype), v[:, lo:lo + d],
                     preferred_element_type=jnp.float32)         # (TQ, d)
        att_ref[:, lo:lo + d] = oh * pl.reciprocal(denom, approx=True)

    # ---- local-pos add + output projection -----------------------------------
    r0 = pl.multiple_of(i * TQ, 8)
    xatt = att_ref[...] + lp_ref[pl.ds(r0, TQ), :]               # (TQ, C) f32
    out = jnp.dot(xatt.astype(wp_ref.dtype), wp_ref[...],
                  preferred_element_type=jnp.float32) + bp_ref[...]
    o_ref[0] = out.astype(o_ref.dtype)


# --------------------------------------------------------------------------- #
# Wrapper helpers
# --------------------------------------------------------------------------- #
def _vmem_limit_bytes():
    """Generation-aware scoped-VMEM limit with headroom (v7x: 64 MiB per TC)."""
    try:
        cap = pltpu.get_tpu_info().vmem_capacity_bytes
    except Exception:
        cap = None
    if not cap:
        cap = 64 * 1024 * 1024
    return int(max(32 * 1024 * 1024,
                   min(cap - 16 * 1024 * 1024, 100 * 1024 * 1024)))


def _choose_tq(N, C, cdt_bytes, budget):
    """Query-row tile: divides N, multiple of 8, fits the VMEM budget,
    preferring multiples of 256 then 128 (MXU occupancy)."""
    # K2 VMEM that does not scale with TQ: resident K/V (double-buffered),
    # local-pos f32 scratch, weights.
    fixed = 2 * 2 * N * C * cdt_bytes + N * C * 4 + 4 * C * C * cdt_bytes
    # Per query row: x tile + out tile (double-buffered), att scratch row,
    # ~2 live (row, N) f32 logit rows under the per-head loop.
    per_row = 2 * C * cdt_bytes + 2 * C * 4 + C * 4 + 2 * N * 4
    cap = min(512, N)
    avail = budget - fixed
    if avail > 0:
        cap = min(cap, max(8, int(avail // per_row) // 8 * 8))
    cands = [t for t in range(8, cap + 1, 8) if N % t == 0]
    if not cands:
        # TODO(synk): for N with no usable divisor or N too large for resident
        # K/V + logits, switch K2 to a flash-style online-softmax K/V loop.
        return N
    for pref in (256, 128):
        picks = [t for t in cands if t % pref == 0]
        if picks:
            return max(picks)
    return max(cands)


# --------------------------------------------------------------------------- #
# Wrapper
# --------------------------------------------------------------------------- #
def local_enhance_efficient_self_atten(x, params, H, W, head,
                                       *, compute_dtype=jnp.bfloat16):
    """x: (B, N, C) with N == H*W. Returns (B, N, C). reduction_ratio == 1.

    compute_dtype: MXU operand dtype (default bf16 -- precision/throughput
    tradeoff for v6e/v7x; pass jnp.float32 for bit-closer results).
    """
    B, N, C = x.shape
    assert N == H * W
    assert C % head == 0
    wq, bq, wkv, bkv, dww, dwb, wp, bp = params
    scale = float((C // head) ** -0.5)
    orig_dtype = x.dtype
    cdt = jnp.dtype(compute_dtype)

    # One-time constant folds / casts (outside the kernels): attention scale
    # folded into the q projection; MXU operands in compute dtype; biases f32.
    x_c = x.astype(cdt)
    wq_s = (wq * scale).astype(cdt)
    bq_s = (bq * scale).astype(jnp.float32)
    wkv_c = wkv.astype(cdt)
    bkv_f = bkv.astype(jnp.float32)
    wp_c = wp.astype(cdt)
    bp_f = bp.astype(jnp.float32)
    dww_f = dww.astype(jnp.float32)
    dwb_f = dwb.astype(jnp.float32)

    vmem_limit = _vmem_limit_bytes()
    TQ = _choose_tq(N, C, cdt.itemsize, vmem_limit)
    n_q = N // TQ

    # ---- K1: k/v projection (q is folded into K2) ---------------------------
    k, v = pl.pallas_call(
        kv_proj_kernel,
        out_shape=(jax.ShapeDtypeStruct((B, N, C), cdt),
                   jax.ShapeDtypeStruct((B, N, C), cdt)),
        grid=(B, n_q),
        in_specs=[
            pl.BlockSpec((1, TQ, C), lambda b, i: (b, i, 0)),     # x tile
            pl.BlockSpec((C, 2 * C), lambda b, i: (0, 0)),        # Wkv
            pl.BlockSpec((1, 2 * C), lambda b, i: (0, 0)),        # bkv
        ],
        out_specs=(pl.BlockSpec((1, TQ, C), lambda b, i: (b, i, 0)),
                   pl.BlockSpec((1, TQ, C), lambda b, i: (b, i, 0))),
        compiler_params=pltpu.CompilerParams(
            dimension_semantics=("parallel", "parallel"),
            vmem_limit_bytes=vmem_limit),
    )(x_c, wkv_c, bkv_f)

    # ---- K2: q-proj + attention + local-pos + projection (fused) ------------
    out = pl.pallas_call(
        functools.partial(attn_kernel, head=head, W=W),
        out_shape=jax.ShapeDtypeStruct((B, N, C), orig_dtype),
        grid=(B, n_q),
        in_specs=[
            pl.BlockSpec((1, TQ, C), lambda b, i: (b, i, 0)),     # x tile
            pl.BlockSpec((C, C), lambda b, i: (0, 0)),            # Wq * scale
            pl.BlockSpec((1, C), lambda b, i: (0, 0)),            # bq * scale
            pl.BlockSpec((1, N, C), lambda b, i: (b, 0, 0)),      # k (full)
            pl.BlockSpec((1, N, C), lambda b, i: (b, 0, 0)),      # v (full)
            pl.BlockSpec((9, C), lambda b, i: (0, 0)),            # dw taps
            pl.BlockSpec((1, C), lambda b, i: (0, 0)),            # dw bias
            pl.BlockSpec((C, C), lambda b, i: (0, 0)),            # Wproj
            pl.BlockSpec((1, C), lambda b, i: (0, 0)),            # bproj
        ],
        out_specs=pl.BlockSpec((1, TQ, C), lambda b, i: (b, i, 0)),
        scratch_shapes=[pltpu.VMEM((N, C), jnp.float32),          # local_pos
                        pltpu.VMEM((TQ, C), jnp.float32)],        # head accum
        compiler_params=pltpu.CompilerParams(
            dimension_semantics=("parallel", "arbitrary"),
            vmem_limit_bytes=vmem_limit),
    )(x_c, wq_s, bq_s, k, v, dww_f, dwb_f, wp_c, bp_f)
    return out


# --------------------------------------------------------------------------- #
# Pure-JAX reference mirroring the PyTorch module (reduction_ratio == 1)
# --------------------------------------------------------------------------- #
def reference(x, params, H, W, head):
    B, N, C = x.shape
    d = C // head
    scale = d ** -0.5
    wq, bq, wkv, bkv, dww, dwb, wp, bp = params
    q = x @ wq + bq[0]
    kv = x @ wkv + bkv[0]
    k, v = kv[..., :C], kv[..., C:]
    qh = q.reshape(B, N, head, d).transpose(0, 2, 1, 3)
    kh = k.reshape(B, N, head, d).transpose(0, 2, 1, 3)
    vh = v.reshape(B, N, head, d).transpose(0, 2, 1, 3)
    attn = jnp.einsum("bhqd,bhkd->bhqk", qh, kh) * scale
    p = jax.nn.softmax(attn, axis=-1)
    att = jnp.einsum("bhqk,bhkd->bhqd", p, vh)
    att = att.transpose(0, 2, 1, 3).reshape(B, N, C)
    vimg = v.reshape(B, H, W, C)
    kker = dww.reshape(3, 3, 1, C)                               # HWIO depthwise
    lp = lax.conv_general_dilated(
        vimg, kker, (1, 1), ((1, 1), (1, 1)),
        dimension_numbers=("NHWC", "HWIO", "NHWC"),
        feature_group_count=C) + dwb[0]
    xatt = att + lp.reshape(B, N, C)
    return xatt @ wp + bp[0]


if __name__ == "__main__":
    B, H, W = 2, 8, 8
    N = H * W
    C, head = 128, 4          # dim=128, head=4, reduction_ratio=1

    key = jax.random.PRNGKey(0)
    ks = jax.random.split(key, 9)
    x = jax.random.normal(ks[0], (B, N, C), jnp.float32)

    # Parameters (Linear weights stored transposed: (in, out)).
    wq = jax.random.normal(ks[1], (C, C), jnp.float32) * 0.05      # q.weight^T
    bq = jax.random.normal(ks[2], (1, C), jnp.float32) * 0.05      # q.bias
    wkv = jax.random.normal(ks[3], (C, 2 * C), jnp.float32) * 0.05  # kv.weight^T
    bkv = jax.random.normal(ks[4], (1, 2 * C), jnp.float32) * 0.05  # kv.bias
    dww = jax.random.normal(ks[5], (9, C), jnp.float32) * 0.1      # dwconv taps
    dwb = jax.random.normal(ks[6], (1, C), jnp.float32) * 0.05     # dwconv bias
    wp = jax.random.normal(ks[7], (C, C), jnp.float32) * 0.05      # proj.weight^T
    bp = jax.random.normal(ks[8], (1, C), jnp.float32) * 0.05      # proj.bias

    params = (wq, bq, wkv, bkv, dww, dwb, wp, bp)
    ref = reference(x, params, H, W, head)

    # Full-precision MXU path: correctness of the fused math.
    out_f32 = local_enhance_efficient_self_atten(
        x, params, H, W, head, compute_dtype=jnp.float32)
    out_f32 = jax.block_until_ready(out_f32)
    assert out_f32.shape == (B, N, C)
    err32 = float(jnp.max(jnp.abs(out_f32 - ref)))
    assert jnp.allclose(out_f32, ref, atol=1e-2, rtol=1e-2), err32

    # Default bf16 MXU path: deliberate precision/throughput tradeoff
    # (v6e/v7x), so the tolerance is loosened accordingly.
    out_bf = local_enhance_efficient_self_atten(x, params, H, W, head)
    out_bf = jax.block_until_ready(out_bf)
    assert out_bf.shape == (B, N, C)
    errbf = float(jnp.max(jnp.abs(out_bf - ref)))
    assert jnp.allclose(out_bf, ref, atol=5e-2, rtol=5e-2), errbf

    print("KERNEL_OK")
</pallas_src>

<mosaic_0001>
module attributes {stable_mosaic.version = 11 : i64} {
  func.func @kv_proj_kernel(%arg0: i32, %arg1: i32, %arg2: memref<1x64x128xf32, #tpu.memory_space<vmem>>, %arg3: memref<128x256xf32, #tpu.memory_space<vmem>>, %arg4: memref<1x256xf32, #tpu.memory_space<vmem>>, %arg5: memref<1x64x128xf32, #tpu.memory_space<vmem>>, %arg6: memref<1x64x128xf32, #tpu.memory_space<vmem>>) attributes {dimension_semantics = [#tpu.dimension_semantics<parallel>, #tpu.dimension_semantics<parallel>], iteration_bounds = array<i64: 2, 1>, scalar_prefetch = 0 : i64, scratch_operands = 0 : i64, tpu.core_type = #tpu.core_type<tc>, window_params = [{transform_indices = @transform_0, window_bounds = array<i64: 1, 64, 128>}, {pipeline_mode = #tpu.pipeline_mode<synchronous>, transform_indices = @transform_1, window_bounds = array<i64: 128, 256>}, {pipeline_mode = #tpu.pipeline_mode<synchronous>, transform_indices = @transform_2, window_bounds = array<i64: 1, 256>}, {transform_indices = @transform_3, window_bounds = array<i64: 1, 64, 128>}, {transform_indices = @transform_4, window_bounds = array<i64: 1, 64, 128>}]} {
    %c0 = arith.constant 0 : index
    %c0_0 = arith.constant 0 : index
    %c0_1 = arith.constant 0 : index
    %0 = vector.load %arg2[%c0, %c0_0, %c0_1] : memref<1x64x128xf32, #tpu.memory_space<vmem>>, vector<1x64x128xf32>
    %1 = vector.shape_cast %0 : vector<1x64x128xf32> to vector<64x128xf32>
    %c0_2 = arith.constant 0 : index
    %c0_3 = arith.constant 0 : index
    %2 = vector.load %arg3[%c0_2, %c0_3] : memref<128x256xf32, #tpu.memory_space<vmem>>, vector<128x256xf32>
    %cst = arith.constant dense<0.000000e+00> : vector<64x256xf32>
    %3 = tpu.matmul %1, %2, %cst {dimension_numbers = #tpu.dot_dimension_numbers<[1], [0], [0], [1], [0, 0, 1, 1], [], []>} : vector<64x128xf32>, vector<128x256xf32>, vector<64x256xf32> -> vector<64x256xf32>
    %c0_4 = arith.constant 0 : index
    %c0_5 = arith.constant 0 : index
    %4 = vector.load %arg4[%c0_4, %c0_5] : memref<1x256xf32, #tpu.memory_space<vmem>>, vector<1x256xf32>
    %5 = vector.broadcast %4 : vector<1x256xf32> to vector<64x256xf32>
    %6 = arith.addf %3, %5 : vector<64x256xf32>
    %7 = vector.extract_strided_slice %6 {offsets = [0, 0], sizes = [64, 128], strides = [1, 1]} : vector<64x256xf32> to vector<64x128xf32>
    %c0_6 = arith.constant 0 : index
    %c0_7 = arith.constant 0 : index
    %c0_8 = arith.constant 0 : index
    %8 = vector.load %arg5[%c0_6, %c0_7, %c0_8] : memref<1x64x128xf32, #tpu.memory_space<vmem>>, vector<1x64x128xf32>
    %9 = vector.shape_cast %8 : vector<1x64x128xf32> to vector<64x128xf32>
    %10 = vector.shape_cast %7 : vector<64x128xf32> to vector<1x64x128xf32>
    tpu.vector_store %arg5[%c0_6, %c0_7, %c0_8], %10 {strides = array<i32>} : memref<1x64x128xf32, #tpu.memory_space<vmem>>, vector<1x64x128xf32>,
    %11 = vector.extract_strided_slice %6 {offsets = [0, 128], sizes = [64, 128], strides = [1, 1]} : vector<64x256xf32> to vector<64x128xf32>
    %c0_9 = arith.constant 0 : index
    %c0_10 = arith.constant 0 : index
    %c0_11 = arith.constant 0 : index
    %12 = vector.load %arg6[%c0_9, %c0_10, %c0_11] : memref<1x64x128xf32, #tpu.memory_space<vmem>>, vector<1x64x128xf32>
    %13 = vector.shape_cast %12 : vector<1x64x128xf32> to vector<64x128xf32>
    %14 = vector.shape_cast %11 : vector<64x128xf32> to vector<1x64x128xf32>
    tpu.vector_store %arg6[%c0_9, %c0_10, %c0_11], %14 {strides = array<i32>} : memref<1x64x128xf32, #tpu.memory_space<vmem>>, vector<1x64x128xf32>,
    return
  }
  func.func @transform_0(%arg0: i32, %arg1: i32) -> (i32, i32, i32) {
    %c0_i32 = arith.constant 0 : i32
    %c0_i32_0 = arith.constant 0 : i32
    return %arg0, %arg1, %c0_i32 : i32, i32, i32
  }
  func.func @transform_1(%arg0: i32, %arg1: i32) -> (i32, i32) {
    %c0_i32 = arith.constant 0 : i32
    %c0_i32_0 = arith.constant 0 : i32
    %c0_i32_1 = arith.constant 0 : i32
    return %c0_i32, %c0_i32_0 : i32, i32
  }
  func.func @transform_2(%arg0: i32, %arg1: i32) -> (i32, i32) {
    %c0_i32 = arith.constant 0 : i32
    %c0_i32_0 = arith.constant 0 : i32
    %c0_i32_1 = arith.constant 0 : i32
    return %c0_i32, %c0_i32_0 : i32, i32
  }
  func.func @transform_3(%arg0: i32, %arg1: i32) -> (i32, i32, i32) {
    %c0_i32 = arith.constant 0 : i32
    %c0_i32_0 = arith.constant 0 : i32
    return %arg0, %arg1, %c0_i32 : i32, i32, i32
  }
  func.func @transform_4(%arg0: i32, %arg1: i32) -> (i32, i32, i32) {
    %c0_i32 = arith.constant 0 : i32
    %c0_i32_0 = arith.constant 0 : i32
    return %arg0, %arg1, %c0_i32 : i32, i32, i32
  }
}

</mosaic_0001>

<bundles_post_ra>
// kernel: tpu_custom_call.1
= control target key start
LH: loop header
LB: loop body
LE: loop exit
PB: predicated region body
PF: predicated region fallthrough
CT: control target
= control target key end

     0   :  { %10 = vsyncpa [#allocation3], 0  ;;  %s1292_s0 = inlined_call_operand.hbm [shape: f32[2,64,128], index: 0, kind: input, shape index: {}]   ;;  %s1293_s1 = inlined_call_operand.hbm [shape: f32[128,256], index: 1, kind: input, shape index: {}]   ;;  %s1294_s2 = inlined_call_operand.vmem [shape: f32[1,256], index: 2, kind: input, shape index: {}]   ;;  %s1295_s3 = inlined_call_operand.hbm [shape: f32[2,64,128], index: 3, kind: output, shape index: {0}]   ;;  %s1296_s4 = inlined_call_operand.hbm [shape: f32[2,64,128], index: 4, kind: output, shape index: {1}]  }
   0x1   :  { %12 = vsyncpa [#allocation3 + $0x1], 0 }
   0x2   :  { %13 = vsyncpa [#allocation6], 0 }
   0x3   :  { %14 = vsyncpa [#allocation4], 0 }
   0x4   :  { %16 = vsyncpa [#allocation4 + $0x1], 0 }
   0x5   :  { %17 = vsyncpa [#allocation9], 0 }
   0x6   :  { %19 = vsyncpa [#allocation9 + $0x1], 0  ;;  %s988_s15 = smov 0   ;;  %s990_s16 = smov 0  }
   0x7   :  { %s992_s17 = smov 0   ;;  %s994_s18 = smov 0  }
   0x8   :  { %s996_s19 = smov 0   ;;  %s998_s20 = smov 0  }
   0x9 LB: > { %s617_s21 = sadd.s32 4294967295, %s950_s20   ;;  %s618_s22 = sadd.s32 4294967294, %s950_s20   ;;  %s950_s20 = sphi %s998_s20, %s25_s20   ;;  %s946_s19 = sphi %s996_s19, %s1320_s19   ;;  %s942_s18 = sphi %s994_s18, %s1319_s18   ;;  %s938_s17 = sphi %s992_s17, %s1318_s17   ;;  %s934_s16 = sphi %s990_s16, %s1317_s16   ;;  %s930_s15 = sphi %s988_s15, %s1316_s15  }
   0xa   : > { %p59_p0 = scmp.ne.s32.totalorder %s934_s16, %s930_s15  ;;  %p1022_p1 = scmp.eq.s32.totalorder %s617_s21, 0 }
   0xb   : > { %p1026_p2 = scmp.eq.s32.totalorder %s617_s21, 1  ;;  %p133_p3 = scmp.eq.s32.totalorder %s618_s22, 1 }
   0xc   : > { %s1301_s23 = scalar_select %p1022_p1, 1, 0 }
   0xd   : > { %s1302_s24 = scalar_select %p1026_p2, 1, 0 }
   0xe   : > { %p1032_p4 = por %p1022_p1, %p59_p0  ;;  %p619_p5 = scmp.ge.s32.totalorder %s950_s20, 1 }
   0xf   : > { %p1037_p6 = por %p133_p3, %p59_p0  ;;  %p168_p7 = scmp.lt.s32.totalorder %s950_s20, 3 }
  0x10   : > { %s1303_s25 = scalar_select %p1032_p4, 1, 0 }
  0x11   : > { %s1304_s26 = scalar_select %p1037_p6, 1, 0 }
  0x12   : > { %p1042_p8 = pnand %p619_p5, %p168_p7  ;;  %s952_s28 = smov [#allocation5]  }
  0x13   : > { %s180_s29 = sshll.u32 %s952_s28, 4  ;;  %s37_s5 = sadd.s32 1, %s946_s19  ;;  %s181_s29 = int_to_ptr.vmem [resolvable:$true] %s180_s29 }
  0x14   : > { %s1305_s27 = scalar_select %p1042_p8, 1, 0 }
  0x15   : > { %p699_p9 = pneg %p1042_p8  ;;  %s774_s8 = scalar_lea.hbm %s1293_s1, 4096 }
  0x16   : > { %p775_p12 = scmp.ne.s32.totalorder %s1293_s1, %s774_s8  ;;  %p781_p5 = scmp.lt.u32.totalorder %s774_s8, %s1293_s1 }
  0x17   : > { %p1051_p11 = pnand %p699_p9, %p1022_p1 }
  0x19   : > { %p776_p13 = pneg %p1051_p11 }
  0x1b   : > { %p777_p0 = pnand %p776_p13, %p775_p12 }
  0x1d   : > { %p778_p3 = pneg %p777_p0 }
  0x1f   : > { %p783_p7 = pnand %p781_p5, %p778_p3 }
  0x21   : > { %786 = shalt.err (!%p783_p7)
}
  0x22   : > { %s787_s13 = scalar_lea.vmem %s181_s29, 4096  ;;  %p795_p1 = scmp.lt.s32.totalorder %s181_s29, %s181_s29 }
  0x23   : > { %p788_p9 = scmp.ne.s32.totalorder %s181_s29, %s787_s13  ;;  %p796_p4 = scmp.lt.s32.totalorder %s787_s13, %s787_s13 }
  0x25   : > { %p790_p10 = pnand %p788_p9, %p776_p13  ;;  %p797_p8 = por %p796_p4, %p795_p1 }
  0x27   : > { %p791_p6 = pneg %p790_p10 }
  0x29   : > { %p798_p2 = pnand %p797_p8, %p791_p6 }
  0x2b   : > { %801 = shalt.err (!%p798_p2)
}
  0x2c   : > { %s953_s14 = smov 256   ;;  %s954_s21 = smov 16  }
  0x2d   : > { %702 = dma.hbm_to_vmem [thread:$0]  (!%p1051_p11), %s1293_s1, 4096, %s181_s29, [#allocation6], %s953_s14, %s953_s14, %s954_s21  }
  0x2e   : > { %p39_p1 = scmp.ge.s32.totalorder %s37_s5, 2  ;;  %s46_s6 = sadd.s32 1, %s938_s17 }
  0x2f   : > { %p53_p2 = scmp.ne.s32.totalorder %s938_s17, %s934_s16  ;;  %p54_p4 = scmp.eq.s32.totalorder %s950_s20, 0 }
  0x30   : > { %s1322_s5 = smov (%p39_p1, %s37_s5), 0  ;;  %p1308_p8 = scmp.ne.s32.totalorder %s1302_s24, 0 }
  0x31   : > { %p1078_p6 = por %p54_p4, %p53_p2  ;;  %s41_s30 = ssub.s32 %s946_s19, %s1322_s5 }
  0x32   : > { %p1084_p10 = por %p1308_p8, %p53_p2  ;;  %p715_p12 = scmp.lt.s32.totalorder %s950_s20, 2 }
  0x33   : > { %p44_p11 = scmp.eq.s32.totalorder %s41_s30, 0  ;;  %s197_s29 = sand.u32 1, %s938_s17  }
  0x34   : > { %s622_s9 = sshll.u32 %s197_s29, 6  ;;  %s638_s11 = sshll.u32 %s946_s19, 10 }
  0x35   : > { %s1093_s10 = scalar_select %p44_p11, %s938_s17, %s46_s6  }
  0x36   : > { %s1099_s14 = scalar_lea.hbm %s1292_s0, %s638_s11  ;;  %s201_s24 = scalar_lea.vmem [#allocation2], %s622_s9 }
  0x37   : > { %s210_s21 = sshll.u32 %s201_s24, 4  ;;  %p1105_p13 = pnand %p715_p12, %p1078_p6  ;;  %s1101_s21 = int_to_ptr.vmem [resolvable:$true] %s210_s21 }
  0x38   : > { %s1109_s28 = scalar_lea.sflag [#allocation3], %s197_s29  ;;  %s802_s6 = scalar_lea.hbm %s1099_s14, 1024 }
  0x39   : > { %p803_p0 = scmp.ne.s32.totalorder %s1099_s14, %s802_s6  ;;  %p804_p3 = pneg %p1105_p13 }
  0x3a   : > { %s807_s7 = scalar_lea.hbm %s1292_s0, 2048  ;;  %p808_p9 = scmp.lt.u32.totalorder %s1099_s14, %s1292_s0 }
  0x3b   : > { %p805_p5 = pnand %p804_p3, %p803_p0  ;;  %p809_p1 = scmp.lt.u32.totalorder %s807_s7, %s802_s6 }
  0x3c   : > { %p811_p4 = scmp.lt.u32.totalorder %s802_s6, %s1099_s14 }
  0x3d   : > { %p806_p7 = pneg %p805_p5  ;;  %p810_p2 = por %p809_p1, %p808_p9 }
  0x3f   : > { %p812_p6 = por %p811_p4, %p810_p2 }
  0x41   : > { %p813_p8 = pnand %p812_p6, %p806_p7 }
  0x43   : > { %816 = shalt.err (!%p813_p8)
}
  0x44   : > { %s817_s29 = scalar_lea.vmem %s1101_s21, 1024  ;;  %s955_s13 = smov [#allocation2]  }
  0x45   : > { %p818_p12 = scmp.ne.s32.totalorder %s1101_s21, %s817_s29  ;;  %s822_s24 = sshll.u32 %s955_s13, 4  ;;  %s823_s24 = int_to_ptr.vmem [resolvable:$false] %s822_s24 }
  0x46   : > { %s824_s30 = scalar_lea.vmem %s823_s24, 2048  ;;  %p825_p5 = scmp.lt.s32.totalorder %s1101_s21, %s823_s24 }
  0x47   : > { %p820_p11 = pnand %p818_p12, %p804_p3  ;;  %p826_p9 = scmp.lt.s32.totalorder %s824_s30, %s817_s29 }
  0x49   : > { %p821_p0 = pneg %p820_p11  ;;  %p827_p1 = por %p826_p9, %p825_p5 }
  0x4b   : > { %p828_p2 = pnand %p827_p1, %p821_p0 }
  0x4d   : > { %831 = shalt.err (!%p828_p2)
}
  0x4e   : > { %s956_s6 = smov 128   ;;  %s957_s9 = smov 8  }
  0x4f   : > { %706 = dma.hbm_to_vmem [thread:$0]  (!%p1105_p13), %s1099_s14, 1024, %s1101_s21, %s1109_s28, %s956_s6, %s956_s6, %s957_s9  }
  0x50   : > { %p1311_p3 = scmp.ne.s32.totalorder %s1305_s27, 0 }
  0x51   : > { %s1140_s7 = sand.u32 (!%p1311_p3), 1, %s934_s16   ;;  %p1312_p7 = scmp.ne.s32.totalorder (!%p1311_p3), %s1303_s25, 0 }
  0x52   : > { %222 = sbr.rel (%p1311_p3) target bundleno = 393 (0x189), region = 32  ;;  %s1143_s11 = sshll.u32 (!%p1311_p3), %s1140_s7, 6 }
  0x53   : > { %s225_s12 = scalar_lea.sflag (!%p1311_p3), [#allocation3], %s1140_s7  ;;  %s1147_s29 = scalar_lea.vmem (!%p1311_p3), [#allocation2], %s1143_s11 }
  0x59   : > { %913 = dma.done.wait (%p1312_p7), %s225_s12, 1024  }
  0x5a   : > { %915 = vsyncadd (%p1312_p7), %s225_s12, 4294966272  ;;  %p1313_p13 = scmp.ne.s32.totalorder %s1301_s23, 0 }
  0x5c   : > { %917 = dma.done.wait (%p1313_p13), [#allocation6], 4096  }
  0x5d   : > { %919 = vsyncadd (%p1313_p13), [#allocation6], 4294963200  ;;  %v958_v0 = vmov 0.0   ;;  %v274_v1 = vld [vmem:[#allocation5 + $0x8] sm:$0xff]  ;;  %v276_v2 = vld [vmem:[#allocation5 + $0x18] sm:$0xff]  ;;  %v307_v57 = vlaneseq  ;;  %s1177_s27 = scalar_lea.vmem [#allocation7], %s1143_s11 }
  0x5e   : > { %381 = vmatprep.mubr.f32.mxu0 %v958_v0  ;;  %405 = vmatprep.mubr.f32.mxu1 %v958_v0  ;;  %v273_v3 = vld [vmem:[#allocation5] sm:$0xff]  ;;  %v641_v4 = vpack.c.bf16 %v276_v2, %v274_v1  ;;  %v275_v5 = vld [vmem:[#allocation5 + $0x10] sm:$0xff]  ;;  %v278_v6 = vld [vmem:[#allocation5 + $0x28] sm:$0xff]  ;;  %s1182_s14 = scalar_lea.vmem [#allocation8], %s1143_s11  ;;  %s467_s21 = sshll.u32 %s1177_s27, 4  ;;  %s1193_s21 = int_to_ptr.vmem [resolvable:$true] %s467_s21 }
  0x5f   : > { %v280_v7 = vld [vmem:[#allocation5 + $0x38] sm:$0xff]  ;;  %v643_v8 = vpack.c.bf16 %v275_v5, %v273_v3  ;;  %v277_v10 = vld [vmem:[#allocation5 + $0x20] sm:$0xff]  ;;  %v279_v11 = vld [vmem:[#allocation5 + $0x30] sm:$0xff]  ;;  %v308_v58 = vshrl.u32 %v307_v57, 7  ;;  %s485_s22 = sshll.u32 %s1182_s14, 4  ;;  %s639_s28 = sshll.u32 %s942_s18, 10  ;;  %s1195_s22 = int_to_ptr.vmem [resolvable:$true] %s485_s22 }
  0x60   : > { %v645_v9 = vpack.c.bf16 %v280_v7, %v278_v6  ;;  %v282_v12 = vld [vmem:[#allocation5 + $0x48] sm:$0xff]  ;;  %642 = vmatprep.subr.bf16.mxu0 %v641_v4  ;;  %673 = vmatprep.subr.bf16.mxu1 %v641_v4  ;;  %v284_v13 = vld [vmem:[#allocation5 + $0x58] sm:$0xff]  ;;  %v647_v14 = vpack.c.bf16 %v279_v11, %v277_v10  ;;  %v281_v16 = vld [vmem:[#allocation5 + $0x40] sm:$0xff]  ;;  %s1204_s24 = scalar_lea.hbm %s1295_s3, %s639_s28  ;;  %s1209_s9 = scalar_lea.hbm %s1296_s4, %s639_s28 }
  0x61   : > { %644 = vmatpush1.bf16.msra.mxu0 %v643_v8  ;;  %681 = vmatpush1.bf16.msra.mxu1 %v643_v8  ;;  %v649_v15 = vpack.c.bf16 %v284_v13, %v282_v12  ;;  %v283_v17 = vld [vmem:[#allocation5 + $0x50] sm:$0xff]  ;;  %v286_v18 = vld [vmem:[#allocation5 + $0x68] sm:$0xff]  ;;  %v288_v19 = vld [vmem:[#allocation5 + $0x78] sm:$0xff]  ;;  %v309_v59 = vsub.s32 0, %v308_v58  ;;  %v313_v61 = vsub.s32 1, %v308_v58  ;;  %s447_s11 = scalar_lea.sflag [#allocation4], %s1140_s7 }
  0x62   : > { %646 = vmatprep.subr.bf16.mxu0 %v645_v9  ;;  %674 = vmatprep.subr.bf16.mxu1 %v645_v9  ;;  %v651_v20 = vpack.c.bf16 %v283_v17, %v281_v16  ;;  %v653_v21 = vpack.c.bf16 %v288_v19, %v286_v18  ;;  %v285_v22 = vld [vmem:[#allocation5 + $0x60] sm:$0xff]  ;;  %v287_v23 = vld [vmem:[#allocation5 + $0x70] sm:$0xff]  ;;  %v290_v24 = vld [vmem:[#allocation5 + $0x88] sm:$0xff]  ;;  %s832_s12 = scalar_lea.vmem %s1193_s21, 1024 }
  0x63   : > { %v292_v25 = vld [vmem:[#allocation5 + $0x98] sm:$0xff]  ;;  %v655_v26 = vpack.c.bf16 %v287_v23, %v285_v22  ;;  %v289_v28 = vld [vmem:[#allocation5 + $0x80] sm:$0xff]  ;;  %v291_v29 = vld [vmem:[#allocation5 + $0x90] sm:$0xff]  ;;  %p833_p4 = scmp.ne.s32.totalorder %s1193_s21, %s832_s12 }
  0x64   : > { %v657_v27 = vpack.c.bf16 %v292_v25, %v290_v24  ;;  %v294_v30 = vld [vmem:[#allocation5 + $0xa8] sm:$0xff]  ;;  %v296_v31 = vld [vmem:[#allocation5 + $0xb8] sm:$0xff]  ;;  %v659_v32 = vpack.c.bf16 %v291_v29, %v289_v28  ;;  %v293_v34 = vld [vmem:[#allocation5 + $0xa0] sm:$0xff] }
  0x65   : > { %648 = vmatpush1.bf16.msra.mxu0 %v647_v14  ;;  %682 = vmatpush1.bf16.msra.mxu1 %v647_v14  ;;  %v661_v33 = vpack.c.bf16 %v296_v31, %v294_v30  ;;  %v295_v35 = vld [vmem:[#allocation5 + $0xb0] sm:$0xff]  ;;  %v298_v36 = vld [vmem:[#allocation5 + $0xc8] sm:$0xff]  ;;  %v300_v37 = vld [vmem:[#allocation5 + $0xd8] sm:$0xff]  ;;  %p834_p6 = pnand %p833_p4, %p1084_p10 }
  0x66   : > { %650 = vmatprep.subr.bf16.mxu0 %v649_v15  ;;  %675 = vmatprep.subr.bf16.mxu1 %v649_v15  ;;  %v663_v38 = vpack.c.bf16 %v295_v35, %v293_v34  ;;  %v665_v39 = vpack.c.bf16 %v300_v37, %v298_v36  ;;  %v297_v40 = vld [vmem:[#allocation5 + $0xc0] sm:$0xff]  ;;  %v299_v41 = vld [vmem:[#allocation5 + $0xd0] sm:$0xff]  ;;  %v302_v42 = vld [vmem:[#allocation5 + $0xe8] sm:$0xff] }
  0x67   : > { %v304_v43 = vld [vmem:[#allocation5 + $0xf8] sm:$0xff]  ;;  %v667_v44 = vpack.c.bf16 %v299_v41, %v297_v40  ;;  %v301_v46 = vld [vmem:[#allocation5 + $0xe0] sm:$0xff]  ;;  %v303_v47 = vld [vmem:[#allocation5 + $0xf0] sm:$0xff]  ;;  %p835_p8 = pneg %p834_p6 }
  0x68   : > { %v669_v45 = vpack.c.bf16 %v304_v43, %v302_v42  ;;  %v671_v48 = vpack.c.bf16 %v303_v47, %v301_v46  ;;  %v265_v49 = vld [vmem:[%s1147_s29] sm:$0xff]  ;;  %v266_v51 = vld [vmem:[%s1147_s29 + $0x8] sm:$0xff]  ;;  %v267_v53 = vld [vmem:[%s1147_s29 + $0x10] sm:$0xff] }
  0x69   : > { %652 = vmatpush1.bf16.msra.mxu0 %v651_v20  ;;  %683 = vmatpush1.bf16.msra.mxu1 %v651_v20  ;;  %v269_v50 = vld [vmem:[%s1147_s29 + $0x20] sm:$0xff]  ;;  %v270_v52 = vld [vmem:[%s1147_s29 + $0x28] sm:$0xff]  ;;  %v271_v54 = vld [vmem:[%s1147_s29 + $0x30] sm:$0xff] }
  0x6a   : > { %654 = vmatprep.subr.bf16.mxu0 %v653_v21  ;;  %676 = vmatprep.subr.bf16.mxu1 %v653_v21  ;;  %v268_v55 = vld [vmem:[%s1147_s29 + $0x18] sm:$0xff]  ;;  %v305_v60 = vld [vmem:[%s1294_s2] sm:$0x3] }
  0x6b   : > { %v272_v56 = vld [vmem:[%s1147_s29 + $0x38] sm:$0xff]  ;;  %v310_v62 = vrot.slane %v305_v60, %v309_v59  ;;  %v314_v63 = vrot.slane %v305_v60, %v313_v61  ;;  %s959_s29 = smov [#allocation7]  }
  0x6c   : > { %s836_s23 = sshll.u32 %s959_s29, 4  ;;  %s837_s23 = int_to_ptr.vmem [resolvable:$false] %s836_s23 }
  0x6d   : > { %656 = vmatpush1.bf16.msra.mxu0 %v655_v26  ;;  %684 = vmatpush1.bf16.msra.mxu1 %v655_v26  ;;  %s838_s25 = scalar_lea.vmem %s837_s23, 2048  ;;  %p839_p12 = scmp.lt.s32.totalorder %s1193_s21, %s837_s23 }
  0x6e   : > { %658 = vmatprep.subr.bf16.mxu0 %v657_v27  ;;  %677 = vmatprep.subr.bf16.mxu1 %v657_v27  ;;  %p840_p11 = scmp.lt.s32.totalorder %s838_s25, %s832_s12 }
  0x70   : > { %p841_p0 = por %p840_p11, %p839_p12 }
  0x71   : > { %660 = vmatpush1.bf16.msra.mxu0 %v659_v32  ;;  %685 = vmatpush1.bf16.msra.mxu1 %v659_v32 }
  0x72   : > { %662 = vmatprep.subr.bf16.mxu0 %v661_v33  ;;  %678 = vmatprep.subr.bf16.mxu1 %v661_v33  ;;  %p842_p5 = pnand %p841_p0, %p835_p8 }
  0x75   : > { %664 = vmatpush1.bf16.msra.mxu0 %v663_v38  ;;  %686 = vmatpush1.bf16.msra.mxu1 %v663_v38 }
  0x76   : > { %666 = vmatprep.subr.bf16.mxu0 %v665_v39  ;;  %679 = vmatprep.subr.bf16.mxu1 %v665_v39 }
  0x79   : > { %668 = vmatpush1.bf16.msra.mxu0 %v667_v44  ;;  %687 = vmatpush1.bf16.msra.mxu1 %v667_v44 }
  0x7a   : > { %670 = vmatprep.subr.bf16.mxu0 %v669_v45  ;;  %680 = vmatprep.subr.bf16.mxu1 %v669_v45 }
  0x7d   : > { %672 = vmatpush1.bf16.msra.mxu0 %v671_v48  ;;  %688 = vmatpush1.bf16.msra.mxu1 %v671_v48 }
  0x80   : > { %382 = vmatmul.mubr.f32.vlgmr.msra.gmra.mrb[0].mxu0 %v265_v49  ;;  %406 = vmatmul.mubr.f32.vlgmr.msra.gmra.mrb[0].mxu1 %v269_v50 }
  0x81   : > { %387 = vmatprep.mubr.f32.mxu0 %v958_v0  ;;  %411 = vmatprep.mubr.f32.mxu1 %v958_v0 }
  0x84   : > { %388 = vmatmul.mubr.f32.gmra.mrb[2].mxu0 %v266_v51  ;;  %412 = vmatmul.mubr.f32.gmra.mrb[2].mxu1 %v270_v52 }
  0x85   : > { %393 = vmatprep.mubr.f32.mxu0 %v958_v0  ;;  %417 = vmatprep.mubr.f32.mxu1 %v958_v0 }
  0x88   : > { %394 = vmatmul.mubr.f32.gmra.mrb[4].mxu0 %v267_v53  ;;  %418 = vmatmul.mubr.f32.gmra.mrb[4].mxu1 %v271_v54 }
  0x89   : > { %399 = vmatprep.mubr.f32.mxu0 %v958_v0  ;;  %423 = vmatprep.mubr.f32.mxu1 %v958_v0 }
  0x8c   : > { %400 = vmatmul.mubr.f32.gmra.mrb[6].mxu0 %v268_v55  ;;  %424 = vmatmul.mubr.f32.gmra.mrb[6].mxu1 %v272_v56 }
 0x153   : > { %v383_v1 = vpop.f32.mrb[0].mxu0  ;;  %v407_v2 = vpop.f32.mrb[0].mxu1 }
 0x154   : > { %v384_v3 = vadd.f32 %v383_v1, %v310_v62  ;;  %v408_v0 = vadd.f32 %v407_v2, %v310_v62  ;;  %v385_v4 = vpop.f32.mrb[1].mxu0  ;;  %v409_v5 = vpop.f32.mrb[1].mxu1 }
 0x155   : > { %v386_v6 = vadd.f32 %v385_v4, %v314_v63  ;;  %v410_v7 = vadd.f32 %v409_v5, %v314_v63 }
 0x156   : > { %430 = vst [vmem:[%s1177_s27] sm:$0xff] %v384_v3  ;;  %434 = vst [vmem:[%s1177_s27 + $0x20] sm:$0xff] %v408_v0 }
 0x157   : > { %438 = vst [vmem:[%s1182_s14] sm:$0xff] %v386_v6  ;;  %442 = vst [vmem:[%s1182_s14 + $0x20] sm:$0xff] %v410_v7  ;;  %v389_v8 = vpop.f32.mrb[2].mxu0  ;;  %v413_v9 = vpop.f32.mrb[2].mxu1 }
 0x158   : > { %v390_v10 = vadd.f32 %v389_v8, %v310_v62  ;;  %v414_v11 = vadd.f32 %v413_v9, %v310_v62  ;;  %v391_v12 = vpop.f32.mrb[3].mxu0  ;;  %v415_v13 = vpop.f32.mrb[3].mxu1 }
 0x159   : > { %v392_v14 = vadd.f32 %v391_v12, %v314_v63  ;;  %v416_v15 = vadd.f32 %v415_v13, %v314_v63 }
 0x15a   : > { %431 = vst [vmem:[%s1177_s27 + $0x8] sm:$0xff] %v390_v10  ;;  %435 = vst [vmem:[%s1177_s27 + $0x28] sm:$0xff] %v414_v11 }
 0x15b   : > { %439 = vst [vmem:[%s1182_s14 + $0x8] sm:$0xff] %v392_v14  ;;  %443 = vst [vmem:[%s1182_s14 + $0x28] sm:$0xff] %v416_v15  ;;  %v395_v16 = vpop.f32.mrb[4].mxu0  ;;  %v419_v17 = vpop.f32.mrb[4].mxu1 }
 0x15c   : > { %v396_v18 = vadd.f32 %v395_v16, %v310_v62  ;;  %v420_v19 = vadd.f32 %v419_v17, %v310_v62  ;;  %v397_v20 = vpop.f32.mrb[5].mxu0  ;;  %v421_v21 = vpop.f32.mrb[5].mxu1 }
 0x15d   : > { %v398_v22 = vadd.f32 %v397_v20, %v314_v63  ;;  %v422_v23 = vadd.f32 %v421_v21, %v314_v63 }
 0x15e   : > { %432 = vst [vmem:[%s1177_s27 + $0x10] sm:$0xff] %v396_v18  ;;  %436 = vst [vmem:[%s1177_s27 + $0x30] sm:$0xff] %v420_v19 }
 0x15f   : > { %440 = vst [vmem:[%s1182_s14 + $0x10] sm:$0xff] %v398_v22  ;;  %444 = vst [vmem:[%s1182_s14 + $0x30] sm:$0xff] %v422_v23  ;;  %v401_v24 = vpop.f32.mrb[6].mxu0  ;;  %v425_v25 = vpop.f32.mrb[6].mxu1 }
 0x160   : > { %v402_v26 = vadd.f32 %v401_v24, %v310_v62  ;;  %v426_v27 = vadd.f32 %v425_v25, %v310_v62  ;;  %v403_v28 = vpop.f32.mrb[7].mxu0  ;;  %v427_v29 = vpop.f32.mrb[7].mxu1 }
 0x161   : > { %v404_v30 = vadd.f32 %v403_v28, %v314_v63  ;;  %v428_v31 = vadd.f32 %v427_v29, %v314_v63 }
 0x162   : > { %433 = vst [vmem:[%s1177_s27 + $0x18] sm:$0xff] %v402_v26  ;;  %437 = vst [vmem:[%s1177_s27 + $0x38] sm:$0xff] %v426_v27 }
 0x163   : > { %441 = vst [vmem:[%s1182_s14 + $0x18] sm:$0xff] %v404_v30  ;;  %445 = vst [vmem:[%s1182_s14 + $0x38] sm:$0xff] %v428_v31 }
 0x164   : > { %845 = shalt.err (!%p842_p5)
}
 0x165   : > { %s846_s27 = scalar_lea.hbm %s1204_s24, 1024  ;;  %s850_s18 = scalar_lea.hbm %s1295_s3, 2048 }
 0x166   : > { %p847_p9 = scmp.ne.s32.totalorder %s1204_s24, %s846_s27  ;;  %p851_p3 = scmp.lt.u32.totalorder %s1204_s24, %s1295_s3 }
 0x167   : > { %p852_p7 = scmp.lt.u32.totalorder %s850_s18, %s846_s27  ;;  %p854_p4 = scmp.lt.u32.totalorder %s846_s27, %s1204_s24 }
 0x168   : > { %p848_p1 = pnand %p847_p9, %p1084_p10 }
 0x169   : > { %p853_p13 = por %p852_p7, %p851_p3 }
 0x16a   : > { %p849_p2 = pneg %p848_p1 }
 0x16b   : > { %p855_p6 = por %p854_p4, %p853_p13 }
 0x16d   : > { %p856_p8 = pnand %p855_p6, %p849_p2 }
 0x16f   : > { %859 = shalt.err (!%p856_p8)
}
 0x170   : > { %s960_s6 = smov 128   ;;  %s961_s12 = smov 8  }
 0x171   : > { %695 = dma.vmem_to_hbm [thread:$0]  (%p1084_p10), %s1193_s21, 1024, %s1204_s24, %s447_s11, %s960_s6, %s960_s6, %s961_s12  }
 0x172   : > { %s452_s29 = scalar_lea.sflag [#allocation9], %s1140_s7  ;;  %s860_s23 = scalar_lea.vmem %s1195_s22, 1024 }
 0x173   : > { %p861_p12 = scmp.ne.s32.totalorder %s1195_s22, %s860_s23  ;;  %s962_s25 = smov [#allocation8]  }
 0x174   : > { %s864_s27 = sshll.u32 %s962_s25, 4  ;;  %s865_s27 = int_to_ptr.vmem [resolvable:$false] %s864_s27 }
 0x175   : > { %p862_p11 = pnand %p861_p12, %p1084_p10  ;;  %s866_s14 = scalar_lea.vmem %s865_s27, 2048 }
 0x176   : > { %p867_p5 = scmp.lt.s32.totalorder %s1195_s22, %s865_s27  ;;  %p868_p9 = scmp.lt.s32.totalorder %s866_s14, %s860_s23 }
 0x177   : > { %p863_p0 = pneg %p862_p11 }
 0x178   : > { %p869_p1 = por %p868_p9, %p867_p5 }
 0x17a   : > { %p870_p2 = pnand %p869_p1, %p863_p0 }
 0x17c   : > { %873 = shalt.err (!%p870_p2)
}
 0x17d   : > { %s874_s21 = scalar_lea.hbm %s1209_s9, 1024  ;;  %s878_s28 = scalar_lea.hbm %s1296_s4, 2048 }
 0x17e   : > { %p875_p3 = scmp.ne.s32.totalorder %s1209_s9, %s874_s21  ;;  %p879_p4 = scmp.lt.u32.totalorder %s1209_s9, %s1296_s4 }
 0x17f   : > { %p880_p6 = scmp.lt.u32.totalorder %s878_s28, %s874_s21  ;;  %p882_p12 = scmp.lt.u32.totalorder %s874_s21, %s1209_s9 }
 0x180   : > { %p876_p7 = pnand %p875_p3, %p1084_p10 }
 0x181   : > { %p881_p8 = por %p880_p6, %p879_p4 }
 0x182   : > { %p877_p13 = pneg %p876_p7 }
 0x183   : > { %p883_p11 = por %p882_p12, %p881_p8 }
 0x185   : > { %p884_p0 = pnand %p883_p11, %p877_p13 }
 0x187   : > { %887 = shalt.err (!%p884_p0)
}
 0x188   : > { %696 = dma.vmem_to_hbm [thread:$0]  (%p1084_p10), %s1195_s22, 1024, %s1209_s9, %s452_s29, %s960_s6, %s960_s6, %s961_s12  }
 0x189 PF: > { %s500_s30 = sand.u32 1, %s930_s15   ;;  %p1314_p5 = scmp.ne.s32.totalorder %s1304_s26, 0 }
 0x18a   : > { %p1315_p9 = scmp.ge.s32.totalorder %s950_s20, 2  ;;  %s501_s23 = scalar_lea.sflag [#allocation4], %s500_s30 }
 0x18c   : > { %p708_p1 = pnand %p1315_p9, %p1314_p5 }
 0x18e   : > { %921 = dma.done.wait (!%p708_p1), %s501_s23, 1024  }
 0x18f   : > { %923 = vsyncadd (!%p708_p1), %s501_s23, 4294966272  ;;  %s510_s8 = scalar_lea.sflag [#allocation9], %s500_s30 }
 0x190   : > { %925 = dma.done.wait (!%p708_p1), %s510_s8, 1024  }
 0x191   : > { %927 = vsyncadd (!%p708_p1), %s510_s8, 4294966272  ;;  %s25_s20 = sadd.s32 1, %s950_s20   ;;  %s1316_s15 = smov %s934_s16 }
 0x192   : > { %p22_p2 = scmp.ge.s32.totalorder %s25_s20, 4   ;;  %s1317_s16 = smov %s938_s17 }
 0x193   : > { %s1318_s17 = smov %s1093_s10  ;;  %s1319_s18 = smov %s946_s19 }
 0x194   : > { %s1320_s19 = smov %s1322_s5  ;;  %24 = sbr.rel (!%p22_p2) target bundleno = 9 (0x9), region = 98 }
 0x19b   :  { %515 = vsyncpa [#allocation3], 1 }
 0x19c   :  { %517 = vsyncpa [#allocation3 + $0x1], 1 }
 0x19d   :  { %518 = vsyncpa [#allocation6], 1 }
 0x19e   :  { %519 = vsyncpa [#allocation4], 1 }
 0x19f   :  { %521 = vsyncpa [#allocation4 + $0x1], 1 }
 0x1a0   :  { %522 = vsyncpa [#allocation9], 1 }
 0x1a1   :  { %524 = vsyncpa [#allocation9 + $0x1], 1 }

</bundles_post_ra>
